<compile_context>
chip_gen: v7x
topology: tpu7x:2x2x1
jax: 0.10.0
libtpu: 0.0.40
codegen_flags: <defaults>
</compile_context>

<pallas_src>
import functools

import jax
import jax.numpy as jnp
from jax.experimental import pallas as pl
from jax.experimental.pallas import tpu as pltpu


# --------------------------------------------------------------------------- #
# Kernels
# --------------------------------------------------------------------------- #
def _addcoords_4d_kernel(x_ref, o_ref, *, c_in, n_extra, x_dim, y_dim, x_tile):
    """4-D path. Blocks: x_ref (1, c_in, x_tile, Y); o_ref (1, c_in+n_extra, x_tile, Y).

    Channel is a non-minor block dim, so every store below is an aligned
    whole-tile store.  Coordinates are generated in registers (no HBM reads).
    """
    o_ref[:, :c_in, :, :] = x_ref[...]

    i = (pl.program_id(1) * x_tile
         + jax.lax.broadcasted_iota(jnp.int32, (x_tile, y_dim), 0))
    j = jax.lax.broadcasted_iota(jnp.int32, (x_tile, y_dim), 1)
    xx = (i.astype(jnp.float32) / float(x_dim - 1)) * 2.0 - 1.0
    yy = (j.astype(jnp.float32) / float(y_dim - 1)) * 2.0 - 1.0
    dt = o_ref.dtype
    xx_c = xx.astype(dt)
    yy_c = yy.astype(dt)
    o_ref[:, c_in + 0:c_in + 1, :, :] = xx_c[None, None, :, :]
    o_ref[:, c_in + 1:c_in + 2, :, :] = yy_c[None, None, :, :]
    if n_extra == 3:
        rr = jnp.sqrt((xx_c.astype(jnp.float32) - 0.5) ** 2
                      + (yy_c.astype(jnp.float32) - 0.5) ** 2)
        o_ref[:, c_in + 2:c_in + 3, :, :] = rr.astype(dt)[None, None, :, :]


def _addcoords_flat_kernel(x_ref, coord_ref, o_ref, *, c_in):
    """Flat path. Blocks: x (1,c_in,s), coords (1,n_extra,s), out (1,c_in+n_extra,s)."""
    o_ref[:, :c_in, :] = x_ref[...]
    o_ref[:, c_in:, :] = coord_ref[...]


# --------------------------------------------------------------------------- #
# Helpers
# --------------------------------------------------------------------------- #
def _vmem_capacity_bytes():
    try:
        return int(pltpu.get_tpu_info().vmem_capacity_bytes)
    except Exception:
        return 64 * 1024 * 1024            # conservative (v7x-sized) fallback


def _choose_tile(extent, bytes_per_unit, batch, target_bytes, multiple):
    """Tile `extent` in units of `multiple`, ~target_bytes of block data per grid
    step, then shrink (when possible) so the grid has >= 4 total steps (keeps
    both v7x TensorCores busy AND double-buffered even at batch == 1)."""
    t = (target_bytes // max(bytes_per_unit, 1)) // multiple * multiple
    t = max(t, multiple)
    want_tiles = max(1, -(-4 // max(batch, 1)))        # ceil(4 / batch)
    for want in (want_tiles, 2):
        if want <= 1:
            break
        cand = (extent // want) // multiple * multiple
        if cand >= multiple:
            t = min(t, cand)
            break
    if t >= extent:
        return int(extent)        # full extent is always a legal minor block dim
    return int(t)


def _coord_channels(x_dim, y_dim, dtype, with_r):
    """(1, n_extra, X*Y) coordinate ramps (flat path only; DMA'd once total)."""
    xs = (jnp.arange(x_dim, dtype=jnp.float32) / (x_dim - 1)) * 2.0 - 1.0
    ys = (jnp.arange(y_dim, dtype=jnp.float32) / (y_dim - 1)) * 2.0 - 1.0
    xx = jnp.broadcast_to(xs[:, None], (x_dim, y_dim)).astype(dtype)
    yy = jnp.broadcast_to(ys[None, :], (x_dim, y_dim)).astype(dtype)
    chans = [xx, yy]
    if with_r:
        rr = jnp.sqrt((xx.astype(jnp.float32) - 0.5) ** 2
                      + (yy.astype(jnp.float32) - 0.5) ** 2).astype(dtype)
        chans.append(rr)
    return jnp.stack(chans, axis=0).reshape(1, len(chans), x_dim * y_dim)


# --------------------------------------------------------------------------- #
# pallas_call wrappers
# --------------------------------------------------------------------------- #
def _add_coords_4d(x, with_r, target_block_bytes, vmem_limit, sub_mult):
    b, c_in, x_dim, y_dim = x.shape
    n_extra = 3 if with_r else 2
    c_out = c_in + n_extra
    xy = x_dim * y_dim
    itemsize = jnp.dtype(x.dtype).itemsize

    x_tile = _choose_tile(x_dim, (c_in + c_out) * y_dim * itemsize, b,
                          target_block_bytes, sub_mult)
    grid = (b, pl.cdiv(x_dim, x_tile))

    kernel = functools.partial(_addcoords_4d_kernel, c_in=c_in, n_extra=n_extra,
                               x_dim=x_dim, y_dim=y_dim, x_tile=x_tile)
    cost = pl.CostEstimate(
        flops=8 * b * xy,
        transcendentals=(b * xy if with_r else 0),
        bytes_accessed=(b * c_in * xy + b * c_out * xy) * itemsize)

    return pl.pallas_call(
        kernel,
        out_shape=jax.ShapeDtypeStruct((b, c_out, x_dim, y_dim), x.dtype),
        grid_spec=pltpu.PrefetchScalarGridSpec(
            num_scalar_prefetch=0,
            grid=grid,
            in_specs=[pl.BlockSpec((1, c_in, x_tile, y_dim),
                                   lambda nb, xi: (nb, 0, xi, 0))],
            out_specs=pl.BlockSpec((1, c_out, x_tile, y_dim),
                                   lambda nb, xi: (nb, 0, xi, 0)),
        ),
        compiler_params=pltpu.CompilerParams(
            dimension_semantics=("parallel", "parallel"),
            vmem_limit_bytes=vmem_limit),
        cost_estimate=cost,
    )(x)


def _add_coords_flat(x, with_r, target_block_bytes, vmem_limit):
    b, c_in, x_dim, y_dim = x.shape
    n_extra = 3 if with_r else 2
    c_out = c_in + n_extra
    xy = x_dim * y_dim
    itemsize = jnp.dtype(x.dtype).itemsize

    x3 = x.reshape(b, c_in, xy)                               # contiguous: free
    coords = _coord_channels(x_dim, y_dim, x.dtype, with_r)   # (1, n_extra, xy)

    s_tile = _choose_tile(xy, (c_in + n_extra + c_out) * itemsize, b,
                          target_block_bytes, 128)
    # Batch innermost: the coord block index (0, 0, s) is constant across the
    # inner loop, so each coord tile is DMA'd exactly once (not once per batch).
    grid = (pl.cdiv(xy, s_tile), b)

    kernel = functools.partial(_addcoords_flat_kernel, c_in=c_in)
    cost = pl.CostEstimate(
        flops=0, transcendentals=0,
        bytes_accessed=(b * c_in * xy + n_extra * xy + b * c_out * xy) * itemsize)

    out3 = pl.pallas_call(
        kernel,
        out_shape=jax.ShapeDtypeStruct((b, c_out, xy), x.dtype),
        grid_spec=pltpu.PrefetchScalarGridSpec(
            num_scalar_prefetch=0,
            grid=grid,
            in_specs=[
                pl.BlockSpec((1, c_in, s_tile), lambda s, nb: (nb, 0, s)),
                pl.BlockSpec((1, n_extra, s_tile), lambda s, nb: (0, 0, s)),
            ],
            out_specs=pl.BlockSpec((1, c_out, s_tile), lambda s, nb: (nb, 0, s)),
        ),
        compiler_params=pltpu.CompilerParams(
            dimension_semantics=("parallel", "parallel"),
            vmem_limit_bytes=vmem_limit),
        cost_estimate=cost,
    )(x3, coords)
    return out3.reshape(b, c_out, x_dim, y_dim)


def add_coords(x, *, with_r=False):
    """Pallas TPU implementation of AddCoords.forward for NCHW input."""
    b, c_in, x_dim, y_dim = x.shape
    n_extra = 3 if with_r else 2
    c_out = c_in + n_extra
    xy = x_dim * y_dim
    itemsize = jnp.dtype(x.dtype).itemsize

    # Tiny late-CNN feature maps: lane width < one vreg; fixed pallas_call and
    # per-step overhead dominate, so let XLA's fused concat handle it.
    if xy < 128:
        return _add_coords_ref(x, with_r=with_r)

    vmem_cap = _vmem_capacity_bytes()
    vmem_limit = int(min((vmem_cap * 3) // 4, 64 * 1024 * 1024))
    target_block_bytes = int(min(8 * 1024 * 1024, vmem_cap // 8))

    sub_mult = {4: 8, 2: 16, 1: 32}.get(itemsize, 8)
    use_4d = (y_dim % 128 == 0
              and sub_mult * y_dim * (c_in + c_out) * itemsize <= target_block_bytes)
    if use_4d:
        return _add_coords_4d(x, with_r, target_block_bytes, vmem_limit, sub_mult)
    return _add_coords_flat(x, with_r, target_block_bytes, vmem_limit)


# --------------------------------------------------------------------------- #
# Pure-JAX reference (mirrors PyTorch AddCoords.forward exactly)
# --------------------------------------------------------------------------- #
def _add_coords_ref(x, with_r=False):
    bsz, _, x_dim, y_dim = x.shape
    xx = (jnp.arange(x_dim, dtype=jnp.float32) / (x_dim - 1)) * 2.0 - 1.0
    yy = (jnp.arange(y_dim, dtype=jnp.float32) / (y_dim - 1)) * 2.0 - 1.0
    xx_ch = jnp.broadcast_to(xx[None, None, :, None], (bsz, 1, x_dim, y_dim)).astype(x.dtype)
    yy_ch = jnp.broadcast_to(yy[None, None, None, :], (bsz, 1, x_dim, y_dim)).astype(x.dtype)
    ret = jnp.concatenate([x, xx_ch, yy_ch], axis=1)
    if with_r:
        rr = jnp.sqrt((xx_ch.astype(jnp.float32) - 0.5) ** 2
                      + (yy_ch.astype(jnp.float32) - 0.5) ** 2).astype(x.dtype)
        ret = jnp.concatenate([ret, rr], axis=1)
    return ret


if __name__ == "__main__":
    key = jax.random.PRNGKey(0)

    # Flat path (Y not a multiple of 128), module default with_r=False.
    x = jax.random.normal(key, (2, 4, 16, 16), dtype=jnp.float32)
    out = jax.block_until_ready(add_coords(x))
    ref = _add_coords_ref(x)
    assert out.shape == (2, 6, 16, 16) and out.dtype == x.dtype
    assert jnp.allclose(out, ref, atol=1e-5, rtol=1e-5), "mismatch (flat)"

    # Flat path, with_r=True -> (B, C+3, X, Y).
    out_r = jax.block_until_ready(add_coords(x, with_r=True))
    ref_r = _add_coords_ref(x, with_r=True)
    assert out_r.shape == (2, 7, 16, 16) and out_r.dtype == x.dtype
    assert jnp.allclose(out_r, ref_r, atol=1e-5, rtol=1e-5), "mismatch (flat, with_r)"

    # 4-D path (Y multiple of 128, coords generated in-kernel), with_r=True.
    x2 = jax.random.normal(jax.random.PRNGKey(1), (1, 3, 16, 128), dtype=jnp.float32)
    out2 = jax.block_until_ready(add_coords(x2, with_r=True))
    ref2 = _add_coords_ref(x2, with_r=True)
    assert out2.shape == (1, 6, 16, 128) and out2.dtype == x2.dtype
    assert jnp.allclose(out2, ref2, atol=1e-5, rtol=1e-5), "mismatch (4-D, with_r)"

    # Tiny-map fallback (X*Y < 128).
    x3 = jax.random.normal(jax.random.PRNGKey(2), (2, 4, 8, 8), dtype=jnp.float32)
    out3 = jax.block_until_ready(add_coords(x3))
    assert out3.shape == (2, 6, 8, 8)
    assert jnp.allclose(out3, _add_coords_ref(x3), atol=1e-5, rtol=1e-5), "mismatch (tiny)"

    print("KERNEL_OK")
</pallas_src>

<mosaic_0001>
module attributes {stable_mosaic.version = 11 : i64} {
  func.func @_addcoords_flat_kernel(%arg0: i32, %arg1: i32, %arg2: memref<1x4x128xf32, #tpu.memory_space<vmem>>, %arg3: memref<1x2x128xf32, #tpu.memory_space<vmem>>, %arg4: memref<1x6x128xf32, #tpu.memory_space<vmem>>) attributes {dimension_semantics = [#tpu.dimension_semantics<parallel>, #tpu.dimension_semantics<parallel>], iteration_bounds = array<i64: 2, 2>, scalar_prefetch = 0 : i64, scratch_operands = 0 : i64, tpu.core_type = #tpu.core_type<tc>, window_params = [{transform_indices = @transform_0, window_bounds = array<i64: 1, 4, 128>}, {transform_indices = @transform_1, window_bounds = array<i64: 1, 2, 128>}, {transform_indices = @transform_2, window_bounds = array<i64: 1, 6, 128>}]} {
    %c0 = arith.constant 0 : index
    %c0_0 = arith.constant 0 : index
    %c0_1 = arith.constant 0 : index
    %0 = vector.load %arg2[%c0, %c0_0, %c0_1] : memref<1x4x128xf32, #tpu.memory_space<vmem>>, vector<1x4x128xf32>
    %c0_2 = arith.constant 0 : index
    %c0_3 = arith.constant 0 : index
    %c0_4 = arith.constant 0 : index
    %1 = vector.load %arg4[%c0_2, %c0_3, %c0_4] : memref<1x6x128xf32, #tpu.memory_space<vmem>>, vector<1x4x128xf32>
    tpu.vector_store %arg4[%c0_2, %c0_3, %c0_4], %0 {strides = array<i32>} : memref<1x6x128xf32, #tpu.memory_space<vmem>>, vector<1x4x128xf32>,
    %c0_5 = arith.constant 0 : index
    %c0_6 = arith.constant 0 : index
    %c0_7 = arith.constant 0 : index
    %2 = vector.load %arg3[%c0_5, %c0_6, %c0_7] : memref<1x2x128xf32, #tpu.memory_space<vmem>>, vector<1x2x128xf32>
    %c0_8 = arith.constant 0 : index
    %c4 = arith.constant 4 : index
    %c0_9 = arith.constant 0 : index
    %3 = vector.load %arg4[%c0_8, %c4, %c0_9] : memref<1x6x128xf32, #tpu.memory_space<vmem>>, vector<1x2x128xf32>
    tpu.vector_store %arg4[%c0_8, %c4, %c0_9], %2 {strides = array<i32>} : memref<1x6x128xf32, #tpu.memory_space<vmem>>, vector<1x2x128xf32>,
    return
  }
  func.func @transform_0(%arg0: i32, %arg1: i32) -> (i32, i32, i32) {
    %c0_i32 = arith.constant 0 : i32
    %c0_i32_0 = arith.constant 0 : i32
    return %arg1, %c0_i32, %arg0 : i32, i32, i32
  }
  func.func @transform_1(%arg0: i32, %arg1: i32) -> (i32, i32, i32) {
    %c0_i32 = arith.constant 0 : i32
    %c0_i32_0 = arith.constant 0 : i32
    %c0_i32_1 = arith.constant 0 : i32
    return %c0_i32, %c0_i32_0, %arg0 : i32, i32, i32
  }
  func.func @transform_2(%arg0: i32, %arg1: i32) -> (i32, i32, i32) {
    %c0_i32 = arith.constant 0 : i32
    %c0_i32_0 = arith.constant 0 : i32
    return %arg1, %c0_i32, %arg0 : i32, i32, i32
  }
}

</mosaic_0001>

<bundles_post_ra>
// kernel: tpu_custom_call.1
= control target key start
LH: loop header
LB: loop body
LE: loop exit
PB: predicated region body
PF: predicated region fallthrough
CT: control target
= control target key end

     0   :  { %7 = vsyncpa [#allocation3], 0  ;;  %s889_s0 = inlined_call_operand.hbm [shape: f32[2,4,256], index: 0, kind: input, shape index: {}]   ;;  %s890_s1 = inlined_call_operand.hbm [shape: f32[1,2,256], index: 1, kind: input, shape index: {}]   ;;  %s891_s2 = inlined_call_operand.vmem [shape: f32[2,6,256], index: 2, kind: output, shape index: {}]  }
   0x1   :  { %9 = vsyncpa [#allocation3 + $0x1], 0 }
   0x2   :  { %10 = vsyncpa [#allocation5], 0 }
   0x3   :  { %12 = vsyncpa [#allocation5 + $0x1], 0  ;;  %s632_s9 = smov 0   ;;  %s634_s10 = smov 0  }
   0x4   :  { %s636_s11 = smov 0   ;;  %s638_s12 = smov 0  }
   0x5   :  { %s640_s13 = smov 0   ;;  %s642_s14 = smov 0  }
   0x6   :  { %s644_s15 = smov 0   ;;  %s646_s16 = smov 0  }
   0x7   :  { %s648_s17 = smov 0   ;;  %s650_s18 = smov 0  }
   0x8   :  { %s652_s19 = smov 0  }
   0x9 LB: > { %s343_s20 = sadd.s32 4294967295, %s613_s19   ;;  %s27_s21 = sadd.s32 1, %s605_s17  ;;  %s613_s19 = sphi %s652_s19, %s18_s19   ;;  %s609_s18 = sphi %s650_s18, %s925_s18   ;;  %s605_s17 = sphi %s648_s17, %s924_s17   ;;  %s601_s16 = sphi %s646_s16, %s923_s16   ;;  %s597_s15 = sphi %s644_s15, %s922_s15   ;;  %s593_s14 = sphi %s642_s14, %s921_s14   ;;  %s589_s13 = sphi %s640_s13, %s920_s13   ;;  %s585_s12 = sphi %s638_s12, %s919_s12   ;;  %s581_s11 = sphi %s636_s11, %s918_s11   ;;  %s577_s10 = sphi %s634_s10, %s917_s10   ;;  %s573_s9 = sphi %s632_s9, %s916_s9  }
   0xa   : > { %p28_p0 = scmp.ge.s32.totalorder %s27_s21, 2  ;;  %s30_s22 = sadd.s32 1, %s609_s18 }
   0xb   : > { %s39_s23 = sadd.s32 1, %s593_s14  ;;  %p46_p1 = scmp.ne.s32.totalorder %s593_s14, %s589_s13 }
   0xc   : > { %s927_s21 = smov (%p28_p0, %s27_s21), 0  ;;  %s929_s22 = smov (!%p28_p0, %s30_s22), %s609_s18 }
   0xd   : > { %898 = sst [smem:[#allocation8_spill]] %s927_s21  ;;  %s34_s24 = ssub.s32 %s605_s17, %s927_s21 }
   0xe   : > { %p895_p2 = scmp.eq.s32.totalorder %s613_s19, 0  ;;  %p32_p3 = scmp.ge.s32.totalorder %s929_s22, 2 }
   0xf   : > { %p52_p4 = scmp.ne.s32.totalorder %s589_s13, %s585_s12  ;;  %p704_p6 = scmp.eq.s32.totalorder %s343_s20, 0 }
  0x10   : > { %p700_p5 = por %p895_p2, %p46_p1  ;;  %s931_s22 = smov (%p32_p3, %s929_s22), 0 }
  0x11   : > { %901 = sst [smem:[#allocation9_spill]] %s931_s22  ;;  %p712_p7 = por %p704_p6, %p52_p4 }
  0x12   : > { %s718_s28 = ssub.s32 %s609_s18, %s931_s22  ;;  %p894_p8 = scmp.lt.s32.totalorder %s613_s19, 4 }
  0x13   : > { %s902_s27 = scalar_select %p712_p7, 1, 0 }
  0x14   : > { %s36_s29 = sor.u32 %s718_s28, %s34_s24  ;;  %s130_s30 = sand.u32 1, %s593_s14  }
  0x15   : > { %p37_p10 = scmp.eq.s32.totalorder %s36_s29, 0  ;;  %s347_s3 = sshll.u32 %s130_s30, 2 }
  0x16   : > { %s348_s5 = sshll.u32 %s605_s17, 1  ;;  %s134_s7 = scalar_lea.vmem [#allocation2], %s347_s3 }
  0x17   : > { %s725_s4 = scalar_select %p37_p10, %s593_s14, %s39_s23  }
  0x18   : > { %s139_s6 = sadd.s32 %s609_s18, %s348_s5  ;;  %s143_s8 = sshll.u32 %s134_s7, 4  ;;  %s729_s8 = int_to_ptr.vmem [resolvable:$true] %s143_s8 }
  0x19   : > { %s349_s12 = sshll.u32 %s139_s6, 6  ;;  %p740_p11 = pnand %p894_p8, %p700_p5 }
  0x1a   : > { %s734_s21 = scalar_lea.hbm %s889_s0, %s349_s12  ;;  %s131_s24 = scalar_lea.sflag [#allocation3], %s130_s30 }
  0x1b   : > { %s459_s29 = scalar_lea.hbm %s734_s21, 64  ;;  %p461_p1 = pneg %p740_p11 }
  0x1c   : > { %p460_p0 = scmp.ne.s32.totalorder %s734_s21, %s459_s29  ;;  %s464_s3 = scalar_lea.hbm %s889_s0, 256 }
  0x1d   : > { %p465_p5 = scmp.lt.u32.totalorder %s734_s21, %s889_s0  ;;  %p466_p10 = scmp.lt.u32.totalorder %s464_s3, %s459_s29 }
  0x1e   : > { %p462_p3 = pnand %p461_p1, %p460_p0  ;;  %p468_p2 = scmp.lt.u32.totalorder %s459_s29, %s734_s21 }
  0x1f   : > { %p467_p8 = por %p466_p10, %p465_p5 }
  0x20   : > { %p463_p4 = pneg %p462_p3 }
  0x21   : > { %p469_p9 = por %p468_p2, %p467_p8 }
  0x23   : > { %p470_p12 = pnand %p469_p9, %p463_p4 }
  0x25   : > { %473 = shalt.err (!%p470_p12)
}
  0x26   : > { %s474_s30 = scalar_lea.vmem %s729_s8, 64  ;;  %s615_s7 = smov [#allocation2]  }
  0x27   : > { %p475_p0 = scmp.ne.s32.totalorder %s729_s8, %s474_s30  ;;  %s479_s12 = sshll.u32 %s615_s7, 4  ;;  %s480_s12 = int_to_ptr.vmem [resolvable:$false] %s479_s12 }
  0x28   : > { %s481_s20 = scalar_lea.vmem %s480_s12, 128  ;;  %p482_p7 = scmp.lt.s32.totalorder %s729_s8, %s480_s12 }
  0x29   : > { %p477_p3 = pnand %p475_p0, %p461_p1  ;;  %p483_p5 = scmp.lt.s32.totalorder %s481_s20, %s474_s30 }
  0x2b   : > { %p478_p13 = pneg %p477_p3  ;;  %p484_p10 = por %p483_p5, %p482_p7 }
  0x2d   : > { %p485_p2 = pnand %p484_p10, %p478_p13 }
  0x2f   : > { %488 = shalt.err (!%p485_p2)
}
  0x30   : > { %366 = dma.hbm_to_vmem [thread:$0]  (!%p740_p11), %s734_s21, 64, %s729_s8, %s131_s24  }
  0x31   : > { %p904_p7 = scmp.lt.s32.totalorder %s613_s19, 5  ;;  %p905_p8 = scmp.ge.s32.totalorder %s613_s19, 1 }
  0x32   : > { %s65_s29 = sadd.s32 1, %s581_s11  ;;  %p72_p12 = scmp.ne.s32.totalorder %s581_s11, %s577_s10 }
  0x33   : > { %p775_p9 = pnand %p905_p8, %p904_p7  ;;  %p907_p13 = scmp.eq.s32.totalorder %s718_s28, 0 }
  0x34   : > { %p908_p1 = scmp.eq.s32.totalorder %s613_s19, 0  ;;  %p78_p0 = scmp.ne.s32.totalorder %s577_s10, %s573_s9 }
  0x35   : > { %s785_s22 = scalar_select %p907_p13, %s581_s11, %s65_s29  }
  0x36   : > { %p74_p4 = por %p72_p12, %p908_p1  ;;  %s150_s25 = sand.u32 1, %s581_s11  }
  0x37   : > { %s351_s3 = sshll.u32 %s609_s18, 5  ;;  %p795_p3 = por %p78_p0, %p704_p6 }
  0x38   : > { %s350_s21 = sshll.u32 %s150_s25, 1  ;;  %s802_s6 = scalar_lea.hbm %s890_s1, %s351_s3 }
  0x39   : > { %s909_s5 = scalar_select %p795_p3, 1, 0 }
  0x3a   : > { %p910_p11 = scmp.lt.s32.totalorder %s613_s19, 4  ;;  %s154_s26 = scalar_lea.vmem [#allocation4], %s350_s21 }
  0x3b   : > { %s161_s28 = sshll.u32 %s154_s26, 4  ;;  %s151_s30 = scalar_lea.sflag [#allocation5], %s150_s25  ;;  %s810_s28 = int_to_ptr.vmem [resolvable:$true] %s161_s28 }
  0x3c   : > { %p806_p5 = pnand %p910_p11, %p74_p4  ;;  %s489_s7 = scalar_lea.hbm %s802_s6, 32 }
  0x3d   : > { %p490_p6 = scmp.ne.s32.totalorder %s802_s6, %s489_s7  ;;  %s494_s29 = scalar_lea.hbm %s890_s1, 64 }
  0x3e   : > { %p491_p10 = pneg %p806_p5  ;;  %p495_p8 = scmp.lt.u32.totalorder %s802_s6, %s890_s1 }
  0x3f   : > { %p496_p12 = scmp.lt.u32.totalorder %s494_s29, %s489_s7  ;;  %p498_p1 = scmp.lt.u32.totalorder %s489_s7, %s802_s6 }
  0x40   : > { %p492_p2 = pnand %p491_p10, %p490_p6 }
  0x41   : > { %p497_p13 = por %p496_p12, %p495_p8 }
  0x42   : > { %p493_p7 = pneg %p492_p2 }
  0x43   : > { %p499_p4 = por %p498_p1, %p497_p13 }
  0x45   : > { %p500_p0 = pnand %p499_p4, %p493_p7 }
  0x47   : > { %503 = shalt.err (!%p500_p0)
}
  0x48   : > { %s504_s25 = scalar_lea.vmem %s810_s28, 32  ;;  %s616_s21 = smov [#allocation4]  }
  0x49   : > { %p505_p11 = scmp.ne.s32.totalorder %s810_s28, %s504_s25  ;;  %s509_s24 = sshll.u32 %s616_s21, 4  ;;  %s510_s24 = int_to_ptr.vmem [resolvable:$false] %s509_s24 }
  0x4a   : > { %s511_s26 = scalar_lea.vmem %s510_s24, 64  ;;  %p512_p3 = scmp.lt.s32.totalorder %s810_s28, %s510_s24 }
  0x4b   : > { %p507_p6 = pnand %p505_p11, %p491_p10  ;;  %p513_p8 = scmp.lt.s32.totalorder %s511_s26, %s504_s25 }
  0x4d   : > { %p508_p2 = pneg %p507_p6  ;;  %p514_p12 = por %p513_p8, %p512_p3 }
  0x4f   : > { %p515_p13 = pnand %p514_p12, %p508_p2 }
  0x51   : > { %518 = shalt.err (!%p515_p13)
}
  0x52   : > { %369 = dma.hbm_to_vmem [thread:$0]  (!%p806_p5), %s802_s6, 32, %s810_s28, %s151_s30  }
  0x53   : > { %170 = sbr.rel (%p775_p9) target bundleno = 103 (0x67), region = 28  ;;  %s172_s7 = sand.u32 (!%p775_p9), 1, %s589_s13  }
  0x54   : > { %s353_s12 = sshll.u32 (!%p775_p9), %s172_s7, 2  ;;  %s173_s20 = scalar_lea.sflag (!%p775_p9), [#allocation3], %s172_s7 }
  0x55   : > { %s176_s29 = scalar_lea.vmem (!%p775_p9), [#allocation2], %s353_s12  ;;  %p912_p10 = scmp.ne.s32.totalorder (!%p775_p9), %s902_s27, 0 }
  0x5a   : > { %564 = dma.done.wait (%p912_p10), %s173_s20, 64  }
  0x5b   : > { %566 = vsyncadd (%p912_p10), %s173_s20, 4294967232  ;;  %s181_s9 = sand.u32 1, %s577_s10   ;;  %p913_p3 = scmp.ne.s32.totalorder %s909_s5, 0 }
  0x5c   : > { %s354_s3 = sshll.u32 %s181_s9, 1  ;;  %s182_s8 = scalar_lea.sflag [#allocation5], %s181_s9 }
  0x5d   : > { %s185_s6 = scalar_lea.vmem [#allocation4], %s354_s3 }
  0x5e   : > { %568 = dma.done.wait (%p913_p3), %s182_s8, 32  }
  0x5f   : > { %570 = vsyncadd (%p913_p3), %s182_s8, 4294967264  ;;  %p214_p9 = scmp.lt.s32.totalorder %s597_s15, 1  ;;  %p216_p5 = scmp.lt.s32.totalorder %s601_s16, 1  ;;  %v222_v0 = vld [vmem:[%s176_s29] sm:$0xf] }
  0x60   : > { %v224_v1 = vld [vmem:[%s185_s6] sm:$0x3] }
  0x61   : > { %s933_s15 = smov (!%p214_p9, %s597_s15), 1  ;;  %s935_s16 = smov (!%p216_p5, %s601_s16), 1 }
  0x62   : > { %s355_s27 = sshll.u32 %s933_s15, 1 }
  0x63   : > { %s219_s23 = sadd.s32 %s355_s27, %s935_s16 }
  0x64   : > { %s356_s28 = sshll.u32 %s219_s23, 3 }
  0x65   : > { %s221_s21 = scalar_lea.vmem %s891_s2, %s356_s28 }
  0x66   : > { %223 = vst [vmem:[%s221_s21] sm:$0xf] %v222_v0  ;;  %225 = vst [vmem:[%s221_s21 + $0x4] sm:$0x3] %v224_v1 }
  0x67 PF: > { %s18_s19 = sadd.s32 1, %s613_s19   ;;  %s914_s5 = sld [smem:[#allocation8_spill]] }
  0x68   : > { %p15_p7 = scmp.ge.s32.totalorder %s18_s19, 6   ;;  %s915_s24 = sld [smem:[#allocation9_spill]] }
  0x69   : > { %s916_s9 = smov %s577_s10  ;;  %s917_s10 = smov %s581_s11 }
  0x6a   : > { %s918_s11 = smov %s785_s22  ;;  %s919_s12 = smov %s589_s13 }
  0x6b   : > { %s920_s13 = smov %s593_s14  ;;  %s921_s14 = smov %s725_s4 }
  0x6c   : > { %s922_s15 = smov %s605_s17  ;;  %s923_s16 = smov %s609_s18 }
  0x6d   : > { %s924_s17 = smov %s914_s5  ;;  %17 = sbr.rel (!%p15_p7) target bundleno = 9 (0x9), region = 81 }
  0x6e   : > { %s925_s18 = smov %s915_s24 }
  0x74   :  { %253 = vsyncpa [#allocation3], 1 }
  0x75   :  { %255 = vsyncpa [#allocation3 + $0x1], 1 }
  0x76   :  { %256 = vsyncpa [#allocation5], 1 }
  0x77   :  { %258 = vsyncpa [#allocation5 + $0x1], 1 }

</bundles_post_ra>
